<compile_context>
chip_gen: v6e
topology: v6e:2x2x1
jax: 0.10.0
libtpu: 0.0.40
codegen_flags: <defaults>
</compile_context>

<pallas_src>
import functools

import jax
import jax.numpy as jnp
from jax.experimental import pallas as pl
from jax.experimental.pallas import tpu as pltpu


def _round_up(x, m):
    return (x + m - 1) // m * m


# --------------------------------------------------------------------------
# Matmul kernel: y = A @ B + bias, bf16 operands, f32 accumulation in the
# resident output block (no separate accumulator scratch).
# --------------------------------------------------------------------------

def _matmul_kernel(a_ref, b_ref, bias_ref, o_ref):
    k = pl.program_id(2)

    @pl.when(k == 0)
    def _():
        o_ref[...] = jnp.broadcast_to(bias_ref[...], o_ref.shape)

    o_ref[...] += jnp.dot(a_ref[...], b_ref[...],
                          preferred_element_type=jnp.float32)


def _tile_m(M, target=256):
    if M >= target:
        return target
    return max(16, _round_up(M, 16))


def _tile_n(N, target=256):
    if N >= target:
        return target
    return _round_up(N, 128)


def _tile_k(K):
    # Single K block for small / awkward K (avoids padding waste, e.g. K=147
    # or K=576); otherwise pick a deep block that divides K when possible.
    if K <= 1024:
        return _round_up(K, 16)
    for cand in (512, 384, 256):
        if K % cand == 0:
            return cand
    return 512


@jax.jit
def pallas_matmul(a, b, bias=None):
    """a: (M, K), b: (K, N), bias: (N,) or None  ->  (M, N) float32."""
    M, K = a.shape
    K2, N = b.shape
    assert K == K2
    tm = _tile_m(M)
    tn = _tile_n(N)
    tk = _tile_k(K)
    Mp = _round_up(M, tm)
    Np = _round_up(N, tn)
    Kp = _round_up(K, tk)

    a_p = jnp.pad(a.astype(jnp.bfloat16), ((0, Mp - M), (0, Kp - K)))
    b_p = jnp.pad(b.astype(jnp.bfloat16), ((0, Kp - K), (0, Np - N)))
    if bias is None:
        bias_p = jnp.zeros((1, Np), jnp.float32)
    else:
        bias_p = jnp.pad(bias.astype(jnp.float32), (0, Np - N)).reshape(1, Np)

    grid = (Mp // tm, Np // tn, Kp // tk)  # reduction axis (k) last
    out = pl.pallas_call(
        _matmul_kernel,
        out_shape=jax.ShapeDtypeStruct((Mp, Np), jnp.float32),
        grid_spec=pltpu.PrefetchScalarGridSpec(
            num_scalar_prefetch=0,
            grid=grid,
            in_specs=[
                pl.BlockSpec((tm, tk), lambda i, j, k: (i, k)),
                pl.BlockSpec((tk, tn), lambda i, j, k: (k, j)),
                pl.BlockSpec((1, tn), lambda i, j, k: (0, j)),
            ],
            out_specs=pl.BlockSpec((tm, tn), lambda i, j, k: (i, j)),
        ),
        compiler_params=pltpu.CompilerParams(
            dimension_semantics=("parallel", "parallel", "arbitrary"),
            vmem_limit_bytes=32 * 1024 * 1024),
    )(a_p, b_p, bias_p)
    return out[:M, :N]


# --------------------------------------------------------------------------
# BatchNorm (+ residual) (+ ReLU): two-pass, gridded over row tiles.
# --------------------------------------------------------------------------

def _bn_stats_kernel(x_ref, sum_ref, ssq_ref):
    i = pl.program_id(0)

    @pl.when(i == 0)
    def _():
        sum_ref[...] = jnp.zeros_like(sum_ref)
        ssq_ref[...] = jnp.zeros_like(ssq_ref)

    x = x_ref[...]
    sum_ref[...] += jnp.sum(x, axis=0, keepdims=True)
    ssq_ref[...] += jnp.sum(x * x, axis=0, keepdims=True)


def _bn_norm_kernel(*refs, inv_n, eps, do_relu, add_res):
    if add_res:
        x_ref, sum_ref, ssq_ref, g_ref, b_ref, res_ref, o_ref = refs
    else:
        x_ref, sum_ref, ssq_ref, g_ref, b_ref, o_ref = refs
    mean = sum_ref[...] * inv_n
    var = jnp.maximum(ssq_ref[...] * inv_n - mean * mean, 0.0)
    scale = g_ref[...] * jax.lax.rsqrt(var + eps)
    y = (x_ref[...] - mean) * scale + b_ref[...]
    if add_res:
        y = y + res_ref[...]
    if do_relu:
        y = jnp.maximum(y, 0.0)
    o_ref[...] = y


@functools.partial(jax.jit, static_argnames=("do_relu", "eps"))
def bn_act(x, gamma, beta, residual=None, do_relu=True, eps=1e-5):
    """Training-mode batch-norm over all non-channel positions (+res, +ReLU)."""
    shp = x.shape
    C = shp[-1]
    x2 = x.reshape(-1, C).astype(jnp.float32)
    M = x2.shape[0]

    # Row tile sized to roughly 1 MiB per input block.
    cap = max(8, ((1 << 20) // (C * 4)) // 8 * 8)
    tr = max(8, min(_round_up(M, 8), cap))
    Mp = _round_up(M, tr)
    x_p = jnp.pad(x2, ((0, Mp - M), (0, 0)))
    grid = (Mp // tr,)

    # Pass 1: per-channel sum / sum-of-squares (padded rows are zeros and do
    # not perturb the statistics because inv_n uses the true row count).
    sums, ssqs = pl.pallas_call(
        _bn_stats_kernel,
        out_shape=(jax.ShapeDtypeStruct((1, C), jnp.float32),
                   jax.ShapeDtypeStruct((1, C), jnp.float32)),
        grid_spec=pltpu.PrefetchScalarGridSpec(
            num_scalar_prefetch=0,
            grid=grid,
            in_specs=[pl.BlockSpec((tr, C), lambda i: (i, 0))],
            out_specs=(pl.BlockSpec((1, C), lambda i: (0, 0)),
                       pl.BlockSpec((1, C), lambda i: (0, 0)))),
        compiler_params=pltpu.CompilerParams(
            dimension_semantics=("arbitrary",)),
    )(x_p)

    gamma2 = gamma.reshape(1, C).astype(jnp.float32)
    beta2 = beta.reshape(1, C).astype(jnp.float32)

    add_res = residual is not None
    operands = [x_p, sums, ssqs, gamma2, beta2]
    in_specs = [pl.BlockSpec((tr, C), lambda i: (i, 0)),
                pl.BlockSpec((1, C), lambda i: (0, 0)),
                pl.BlockSpec((1, C), lambda i: (0, 0)),
                pl.BlockSpec((1, C), lambda i: (0, 0)),
                pl.BlockSpec((1, C), lambda i: (0, 0))]
    if add_res:
        res2 = residual.reshape(-1, C).astype(jnp.float32)
        res_p = jnp.pad(res2, ((0, Mp - M), (0, 0)))
        operands.append(res_p)
        in_specs.append(pl.BlockSpec((tr, C), lambda i: (i, 0)))

    kern = functools.partial(_bn_norm_kernel, inv_n=1.0 / M, eps=eps,
                             do_relu=do_relu, add_res=add_res)
    out = pl.pallas_call(
        kern,
        out_shape=jax.ShapeDtypeStruct((Mp, C), jnp.float32),
        grid_spec=pltpu.PrefetchScalarGridSpec(
            num_scalar_prefetch=0,
            grid=grid,
            in_specs=in_specs,
            out_specs=pl.BlockSpec((tr, C), lambda i: (i, 0))),
        compiler_params=pltpu.CompilerParams(
            dimension_semantics=("parallel",)),
    )(*operands)
    return out[:M].reshape(shp)


# --------------------------------------------------------------------------
# MaxPool2d(3, stride=2, padding=1) — gridded over output-row tiles.
# --------------------------------------------------------------------------

def _max9_kernel(x_ref, o_ref):
    r = x_ref[0]
    for i in range(1, 9):
        r = jnp.maximum(r, x_ref[i])
    o_ref[...] = r


@jax.jit
def maxpool_3x3_s2(x):
    """MaxPool2d(kernel=3, stride=2, padding=1) on NHWC input."""
    B, H, W, C = x.shape
    Ho = (H + 2 - 3) // 2 + 1
    Wo = (W + 2 - 3) // 2 + 1
    xp = jnp.pad(x, ((0, 0), (1, 1), (1, 1), (0, 0)), constant_values=-1e30)
    # TODO(synk): replace the 9-tap stacked layout with a windowed manual-DMA
    # kernel to remove the 9x HBM expansion at large feature-map sizes.
    wins = [xp[:, i:i + 2 * Ho:2, j:j + 2 * Wo:2, :]
            for i in range(3) for j in range(3)]
    R = B * Ho * Wo
    stacked = jnp.stack(wins, axis=0).reshape(9, R, C).astype(jnp.float32)
    tr = min(_round_up(R, 8), 512)
    Rp = _round_up(R, tr)
    stacked = jnp.pad(stacked, ((0, 0), (0, Rp - R), (0, 0)))
    out = pl.pallas_call(
        _max9_kernel,
        out_shape=jax.ShapeDtypeStruct((Rp, C), jnp.float32),
        grid_spec=pltpu.PrefetchScalarGridSpec(
            num_scalar_prefetch=0,
            grid=(Rp // tr,),
            in_specs=[pl.BlockSpec((9, tr, C), lambda i: (0, i, 0))],
            out_specs=pl.BlockSpec((tr, C), lambda i: (i, 0))),
        compiler_params=pltpu.CompilerParams(
            dimension_semantics=("parallel",)),
    )(stacked)
    return out[:R].reshape(B, Ho, Wo, C)


# --------------------------------------------------------------------------
# AdaptiveAvgPool2d((1,1)) + Flatten — gridded over channel-column tiles.
# --------------------------------------------------------------------------

def _avgpool_kernel(x_ref, o_ref, *, inv_hw):
    o_ref[...] = jnp.sum(x_ref[...], axis=0, keepdims=True) * inv_hw


@jax.jit
def global_avgpool(x):
    """AdaptiveAvgPool2d((1,1)) + Flatten on NHWC input -> (B, C)."""
    B, H, W, C = x.shape
    HW = H * W
    N = B * C
    x2 = jnp.transpose(x, (1, 2, 0, 3)).reshape(HW, N).astype(jnp.float32)
    tc = min(_round_up(N, 128), 2048)
    Np = _round_up(N, tc)
    x_p = jnp.pad(x2, ((0, 0), (0, Np - N)))
    out = pl.pallas_call(
        functools.partial(_avgpool_kernel, inv_hw=1.0 / HW),
        out_shape=jax.ShapeDtypeStruct((1, Np), jnp.float32),
        grid_spec=pltpu.PrefetchScalarGridSpec(
            num_scalar_prefetch=0,
            grid=(Np // tc,),
            in_specs=[pl.BlockSpec((HW, tc), lambda i: (0, i))],
            out_specs=pl.BlockSpec((1, tc), lambda i: (0, i))),
        compiler_params=pltpu.CompilerParams(
            dimension_semantics=("parallel",)),
    )(x_p)
    return out[0, :N].reshape(B, C)


# --------------------------------------------------------------------------
# Convolution: 1x1 convs are pure matmuls; kxk convs use im2col + matmul.
# --------------------------------------------------------------------------

def _im2col(x, kh, kw, stride, pad):
    B, H, W, C = x.shape
    Ho = (H + 2 * pad - kh) // stride + 1
    Wo = (W + 2 * pad - kw) // stride + 1
    xp = jnp.pad(x, ((0, 0), (pad, pad), (pad, pad), (0, 0)))
    cols = []
    for i in range(kh):
        for j in range(kw):
            cols.append(xp[:, i:i + stride * Ho:stride,
                           j:j + stride * Wo:stride, :])
    patches = jnp.stack(cols, axis=3)            # (B, Ho, Wo, kh*kw, C)
    return patches.reshape(B * Ho * Wo, kh * kw * C), Ho, Wo


def conv2d(x, w, stride, pad):
    B = x.shape[0]
    KH, KW, Cin, Cout = w.shape
    if KH == 1 and KW == 1 and pad == 0:
        # 1x1 conv: no patch extraction at all.
        xs = x[:, ::stride, ::stride, :] if stride > 1 else x
        _, Ho, Wo, _ = xs.shape
        y = pallas_matmul(xs.reshape(B * Ho * Wo, Cin), w.reshape(Cin, Cout))
        return y.reshape(B, Ho, Wo, Cout)
    # TODO(synk): implicit-GEMM (taps as an extra reduction axis with shifted
    # input windows via manual DMA) would remove the im2col HBM expansion for
    # the 3x3 / 7x7 convs.
    cols, Ho, Wo = _im2col(x, KH, KW, stride, pad)
    y = pallas_matmul(cols, w.reshape(KH * KW * Cin, Cout))
    return y.reshape(B, Ho, Wo, Cout)


# --------------------------------------------------------------------------
# ResNet-50 encoder (fc = Identity) + SimCLR Projection head
# --------------------------------------------------------------------------

LAYER_CFG = ((64, 3, 1), (128, 4, 2), (256, 6, 2), (512, 3, 2))


def bottleneck(x, blk, stride):
    identity = x
    out = conv2d(x, blk["conv1_w"], stride=1, pad=0)
    out = bn_act(out, blk["bn1_g"], blk["bn1_b"], do_relu=True)
    out = conv2d(out, blk["conv2_w"], stride=stride, pad=1)
    out = bn_act(out, blk["bn2_g"], blk["bn2_b"], do_relu=True)
    out = conv2d(out, blk["conv3_w"], stride=1, pad=0)
    if "ds_w" in blk:
        identity = conv2d(x, blk["ds_w"], stride=stride, pad=0)
        identity = bn_act(identity, blk["ds_g"], blk["ds_b"], do_relu=False)
    out = bn_act(out, blk["bn3_g"], blk["bn3_b"],
                 residual=identity, do_relu=True)
    return out


def encoder_forward(params, x_nhwc):
    y = conv2d(x_nhwc, params["conv1_w"], stride=2, pad=3)
    y = bn_act(y, params["bn1_g"], params["bn1_b"], do_relu=True)
    y = maxpool_3x3_s2(y)
    for li, (_width, nblocks, stride) in enumerate(LAYER_CFG):
        for bi in range(nblocks):
            s = stride if bi == 0 else 1
            y = bottleneck(y, params["layers"][li][bi], s)
    return global_avgpool(y)          # fc == Identity -> (B, 2048)


def simclr_forward(params, x_nchw):
    # PyTorch conv input is NCHW; transpose to NHWC for the TPU kernels.
    x = jnp.transpose(x_nchw, (0, 2, 3, 1)).astype(jnp.float32)
    return encoder_forward(params, x)


def projection_forward(pp, feats):
    # AdaptiveAvgPool2d((1,1)) + Flatten on (B, 2048, 1, 1) features is an
    # identity here (the encoder already globally pooled via a Pallas kernel).
    h = pallas_matmul(feats, pp["fc1_w"], pp["fc1_b"])   # Linear(2048,2048)+bias
    h = bn_act(h, pp["bn_g"], pp["bn_b"], do_relu=True)  # BatchNorm1d + ReLU
    z = pallas_matmul(h, pp["fc2_w"])                    # Linear(2048,128, no bias)
    return z


def simclr_training_step(params, xi, xj, concat_views=True):
    if concat_views:
        # Run encoder + projection once on the concatenated views (2x M per
        # matmul, halves per-call overhead).  Note: with training-mode BN the
        # batch statistics then pool over both views.
        x = jnp.concatenate([xi, xj], axis=0)
        z = projection_forward(params["proj"], simclr_forward(params, x))
        zi, zj = jnp.split(z, 2, axis=0)
        return zi, zj
    zi = projection_forward(params["proj"], simclr_forward(params, xi))
    zj = projection_forward(params["proj"], simclr_forward(params, xj))
    return zi, zj


# --------------------------------------------------------------------------
# Deterministic parameter initialization (shapes match ResNet-50 + Projection)
# --------------------------------------------------------------------------

def _init_conv(key, kh, kw, cin, cout):
    scale = (2.0 / (kh * kw * cin)) ** 0.5
    return jax.random.normal(key, (kh, kw, cin, cout), jnp.float32) * scale


def _init_linear(key, din, dout):
    scale = (1.0 / din) ** 0.5
    return jax.random.normal(key, (din, dout), jnp.float32) * scale


def init_simclr_params(key):
    cnt = [0]

    def nk():
        cnt[0] += 1
        return jax.random.fold_in(key, cnt[0])

    p = {
        "conv1_w": _init_conv(nk(), 7, 7, 3, 64),
        "bn1_g": jnp.ones((64,), jnp.float32),
        "bn1_b": jnp.zeros((64,), jnp.float32),
    }
    layers = []
    in_ch = 64
    for width, nblocks, stride in LAYER_CFG:
        blocks = []
        for bi in range(nblocks):
            s = stride if bi == 0 else 1
            blk = {
                "conv1_w": _init_conv(nk(), 1, 1, in_ch, width),
                "bn1_g": jnp.ones((width,), jnp.float32),
                "bn1_b": jnp.zeros((width,), jnp.float32),
                "conv2_w": _init_conv(nk(), 3, 3, width, width),
                "bn2_g": jnp.ones((width,), jnp.float32),
                "bn2_b": jnp.zeros((width,), jnp.float32),
                "conv3_w": _init_conv(nk(), 1, 1, width, width * 4),
                "bn3_g": jnp.ones((width * 4,), jnp.float32),
                "bn3_b": jnp.zeros((width * 4,), jnp.float32),
            }
            if s != 1 or in_ch != width * 4:
                blk["ds_w"] = _init_conv(nk(), 1, 1, in_ch, width * 4)
                blk["ds_g"] = jnp.ones((width * 4,), jnp.float32)
                blk["ds_b"] = jnp.zeros((width * 4,), jnp.float32)
            blocks.append(blk)
            in_ch = width * 4
        layers.append(blocks)
    p["layers"] = layers
    p["proj"] = {
        "fc1_w": _init_linear(nk(), 2048, 2048),
        "fc1_b": jnp.zeros((2048,), jnp.float32),
        "bn_g": jnp.ones((2048,), jnp.float32),
        "bn_b": jnp.zeros((2048,), jnp.float32),
        "fc2_w": _init_linear(nk(), 2048, 128),
    }
    return p


# TODO(synk): LARS optimizer / LinearWarmupCosineAnnealingLR / weight-decay
# exclusion are host-side training utilities with no kernel equivalent.

if __name__ == "__main__":
    key = jax.random.PRNGKey(0)
    params = init_simclr_params(key)

    # Small input consistent with the module: batch=2, NCHW image (3, 32, 32).
    x = jax.random.normal(jax.random.fold_in(key, 12345),
                          (2, 3, 32, 32), jnp.float32)

    feats = simclr_forward(params, x)            # SimCLR.forward == encoder(x)
    feats = jax.block_until_ready(feats)
    assert feats.shape == (2, 2048), feats.shape

    # Exercise the Projection head (as used in training_step / val_step).
    z = jax.block_until_ready(projection_forward(params["proj"], feats))
    assert z.shape == (2, 128), z.shape

    print("KERNEL_OK")
</pallas_src>

<mosaic_0001>
module attributes {stable_mosaic.version = 11 : i64} {
  func.func @_matmul_kernel(%arg0: i32, %arg1: i32, %arg2: i32, %arg3: memref<256x160xbf16, #tpu.memory_space<vmem>>, %arg4: memref<160x128xbf16, #tpu.memory_space<vmem>>, %arg5: memref<1x128xf32, #tpu.memory_space<vmem>>, %arg6: memref<256x128xf32, #tpu.memory_space<vmem>>) attributes {dimension_semantics = [#tpu.dimension_semantics<parallel>, #tpu.dimension_semantics<parallel>, #tpu.dimension_semantics<arbitrary>], iteration_bounds = array<i64: 2, 1, 1>, scalar_prefetch = 0 : i64, scratch_operands = 0 : i64, tpu.core_type = #tpu.core_type<tc>, window_params = [{transform_indices = @transform_0, window_bounds = array<i64: 256, 160>}, {transform_indices = @transform_1, window_bounds = array<i64: 160, 128>}, {transform_indices = @transform_2, window_bounds = array<i64: 1, 128>}, {transform_indices = @transform_3, window_bounds = array<i64: 256, 128>}]} {
    %c0_i32 = arith.constant 0 : i32
    %0 = arith.cmpi eq, %arg2, %c0_i32 : i32
    %1 = arith.extui %0 : i1 to i32
    %c0_i32_0 = arith.constant 0 : i32
    %2 = arith.cmpi ne, %1, %c0_i32_0 : i32
    scf.if %2 {
      %c0_8 = arith.constant 0 : index
      %c0_9 = arith.constant 0 : index
      %9 = vector.load %arg5[%c0_8, %c0_9] : memref<1x128xf32, #tpu.memory_space<vmem>>, vector<1x128xf32>
      %10 = vector.shape_cast %9 : vector<1x128xf32> to vector<1x128xf32>
      %11 = vector.broadcast %10 : vector<1x128xf32> to vector<256x128xf32>
      %c0_10 = arith.constant 0 : index
      %c0_11 = arith.constant 0 : index
      %12 = vector.load %arg6[%c0_10, %c0_11] : memref<256x128xf32, #tpu.memory_space<vmem>>, vector<256x128xf32>
      tpu.vector_store %arg6[%c0_10, %c0_11], %11 {strides = array<i32>} : memref<256x128xf32, #tpu.memory_space<vmem>>, vector<256x128xf32>,
    } else {
    }
    %c0 = arith.constant 0 : index
    %c0_1 = arith.constant 0 : index
    %3 = vector.load %arg6[%c0, %c0_1] : memref<256x128xf32, #tpu.memory_space<vmem>>, vector<256x128xf32>
    %c0_2 = arith.constant 0 : index
    %c0_3 = arith.constant 0 : index
    %4 = vector.load %arg3[%c0_2, %c0_3] : memref<256x160xbf16, #tpu.memory_space<vmem>>, vector<256x160xbf16>
    %c0_4 = arith.constant 0 : index
    %c0_5 = arith.constant 0 : index
    %5 = vector.load %arg4[%c0_4, %c0_5] : memref<160x128xbf16, #tpu.memory_space<vmem>>, vector<160x128xbf16>
    %cst = arith.constant dense<0.000000e+00> : vector<256x128xf32>
    %6 = tpu.matmul %4, %5, %cst {dimension_numbers = #tpu.dot_dimension_numbers<[1], [0], [0], [1], [0, 0, 1, 1], [], []>} : vector<256x160xbf16>, vector<160x128xbf16>, vector<256x128xf32> -> vector<256x128xf32>
    %7 = arith.addf %3, %6 : vector<256x128xf32>
    %c0_6 = arith.constant 0 : index
    %c0_7 = arith.constant 0 : index
    %8 = vector.load %arg6[%c0_6, %c0_7] : memref<256x128xf32, #tpu.memory_space<vmem>>, vector<256x128xf32>
    tpu.vector_store %arg6[%c0_6, %c0_7], %7 {strides = array<i32>} : memref<256x128xf32, #tpu.memory_space<vmem>>, vector<256x128xf32>,
    return
  }
  func.func @transform_0(%arg0: i32, %arg1: i32, %arg2: i32) -> (i32, i32) {
    %c0_i32 = arith.constant 0 : i32
    return %arg0, %arg2 : i32, i32
  }
  func.func @transform_1(%arg0: i32, %arg1: i32, %arg2: i32) -> (i32, i32) {
    %c0_i32 = arith.constant 0 : i32
    return %arg2, %arg1 : i32, i32
  }
  func.func @transform_2(%arg0: i32, %arg1: i32, %arg2: i32) -> (i32, i32) {
    %c0_i32 = arith.constant 0 : i32
    %c0_i32_0 = arith.constant 0 : i32
    return %c0_i32, %arg1 : i32, i32
  }
  func.func @transform_3(%arg0: i32, %arg1: i32, %arg2: i32) -> (i32, i32) {
    %c0_i32 = arith.constant 0 : i32
    return %arg0, %arg1 : i32, i32
  }
}

</mosaic_0001>

<bundles_post_ra>
// kernel: pallas_matmul.1
= control target key start
LH: loop header
LB: loop body
LE: loop exit
PB: predicated region body
PF: predicated region fallthrough
CT: control target
= control target key end

     0   :  { %s1209_s12 = smov 0   ;;  %s1211_s13 = smov 0   ;;  %s1400_s0 = inlined_call_operand.vmem [shape: bf16[512,160], index: 0, kind: input, shape index: {}]   ;;  %s1401_s1 = inlined_call_operand.vmem [shape: bf16[160,128], index: 1, kind: input, shape index: {}]   ;;  %s1402_s2 = inlined_call_operand.vmem [shape: f32[1,128], index: 2, kind: input, shape index: {}]   ;;  %s1403_s3 = inlined_call_operand.vmem [shape: f32[512,128], index: 3, kind: output, shape index: {}]  }
   0x1   :  { %s1213_s14 = smov 0  }
   0x2 LB: > { %s32_s15 = sadd.s32 1, %s1182_s13  ;;  %p993_p0 = scmp.ge.s32.totalorder %s1186_s14, 1  ;;  %s1186_s14 = sphi %s1213_s14, %s13_s14   ;;  %s1182_s13 = sphi %s1211_s13, %s1405_s13   ;;  %s1178_s12 = sphi %s1209_s12, %s1404_s12  }
   0x3   : > { %p34_p1 = scmp.ge.s32.totalorder %s32_s15, 2  ;;  %p191_p2 = scmp.lt.s32.totalorder %s1186_s14, 3 }
   0x5   : > { %s1407_s15 = smov (%p34_p1, %s32_s15), 0  ;;  %p192_p3 = pnand %p993_p0, %p191_p2 }
   0x6   : > { %s994_s18 = sshll.u32 (!%p192_p3), %s1178_s12, 5 }
   0x7   : > { %195 = sbr.rel (%p192_p3) target bundleno = 309 (0x135), region = 32  ;;  %p236_p4 = scmp.lt.s32.totalorder (!%p192_p3), %s994_s18, 63 }
   0xc   : > { %v1106_v0 = vld [vmem:[%s1401_s1 + $0x38] sm:$0xff]   ;;  %v1188_v1 = vmov 0   ;;  %v1107_v2 = vld [vmem:[%s1401_s1 + $0x30] sm:$0xff]   ;;  %s1409_s18 = smov (!%p236_p4, %s994_s18), 63  ;;  %v1108_v3 = vld [vmem:[%s1401_s1 + $0x28] sm:$0xff]   ;;  %vm599_vm0 = vcmask 261120  }
   0xd   : > { %648 = vmatprep.subr.bf16.mxu0 %v1188_v1  ;;  %1061 = vmatprep.subr.bf16.mxu1 %v1188_v1  ;;  %s1060_s23 = sshll.u32 %s1409_s18, 3  ;;  %v1109_v4 = vld [vmem:[%s1401_s1 + $0x20] sm:$0xff]   ;;  %v1110_v7 = vld [vmem:[%s1401_s1 + $0x18] sm:$0xff]   ;;  %v1111_v8 = vld [vmem:[%s1401_s1 + $0x10] sm:$0xff]  }
   0xe   : > { %649 = vmatpush1.bf16.msra.mxu0 %v1106_v0  ;;  %1071 = vmatpush1.bf16.msra.mxu1 %v1106_v0  ;;  %s1244_s26 = scalar_lea.vmem %s1400_s0, %s1060_s23  ;;  %v1112_v9 = vld [vmem:[%s1401_s1 + $0x8] sm:$0xff]   ;;  %v1113_v10 = vld [vmem:[%s1401_s1] sm:$0xff]   ;;  %s1325_s22 = scalar_lea.vmem %s1403_s3, %s1060_s23 }
   0xf   : > { %650 = vmatprep.subr.bf16.mxu0 %v1188_v1  ;;  %1062 = vmatprep.subr.bf16.mxu1 %v1188_v1  ;;  %v1118_v5 = vld [vmem:[%s1244_s26 + $0x4] ss:$8 sps:$4 sm:$0xff]   ;;  %v1116_v13 = vld [vmem:[%s1244_s26] ss:$8 sps:$4 sm:$0xff]   ;;  %v1122_v15 = vld [vmem:[%s1244_s26 + $0x14] ss:$8 sps:$4 sm:$0xff]  }
  0x10   : > { %v1121_v6 = vld [vmem:[%s1244_s26 + $0x84] ss:$8 sps:$4 sm:$0xff]   ;;  %1042 = vmatprep.mubr.msk.bf16.mxu0 %vm599_vm0, %v1118_v5  ;;  %v1119_v14 = vld [vmem:[%s1244_s26 + $0x80] ss:$8 sps:$4 sm:$0xff]   ;;  %v1124_v16 = vld [vmem:[%s1244_s26 + $0x94] ss:$8 sps:$4 sm:$0xff]  }
  0x11   : > { %1050 = vmatprep.mubr.msk.bf16.mxu1 %vm599_vm0, %v1121_v6  ;;  %v1114_v11 = vld [vmem:[%s1401_s1 + $0x48] sm:$0xff]   ;;  %v1115_v12 = vld [vmem:[%s1401_s1 + $0x40] sm:$0xff]   ;;  %v1126_v17 = vld [vmem:[%s1244_s26 + $0x10] ss:$8 sps:$4 sm:$0xff]  }
  0x12   : > { %651 = vmatpush1.bf16.msra.mxu0 %v1107_v2  ;;  %1072 = vmatpush1.bf16.msra.mxu1 %v1107_v2  ;;  %v1127_v18 = vld [vmem:[%s1244_s26 + $0x90] ss:$8 sps:$4 sm:$0xff]   ;;  %v1128_v19 = vld [vmem:[%s1244_s26 + $0x24] ss:$8 sps:$4 sm:$0xff]   ;;  %v1132_v21 = vld [vmem:[%s1244_s26 + $0x20] ss:$8 sps:$4 sm:$0xff]  }
  0x13   : > { %652 = vmatprep.subr.bf16.mxu0 %v1188_v1  ;;  %1063 = vmatprep.subr.bf16.mxu1 %v1188_v1  ;;  %v1130_v20 = vld [vmem:[%s1244_s26 + $0xa4] ss:$8 sps:$4 sm:$0xff]   ;;  %v1133_v22 = vld [vmem:[%s1244_s26 + $0xa0] ss:$8 sps:$4 sm:$0xff]   ;;  %v1134_v23 = vld [vmem:[%s1244_s26 + $0x34] ss:$8 sps:$4 sm:$0xff]  }
  0x14   : > { %v1136_v24 = vld [vmem:[%s1244_s26 + $0xb4] ss:$8 sps:$4 sm:$0xff]   ;;  %v1138_v25 = vld [vmem:[%s1244_s26 + $0x30] ss:$8 sps:$4 sm:$0xff]   ;;  %v1140_v27 = vld [vmem:[%s1244_s26 + $0x44] ss:$8 sps:$4 sm:$0xff]  }
  0x15   : > { %v1139_v26 = vld [vmem:[%s1244_s26 + $0xb0] ss:$8 sps:$4 sm:$0xff]   ;;  %v1142_v28 = vld [vmem:[%s1244_s26 + $0xc4] ss:$8 sps:$4 sm:$0xff]   ;;  %v1144_v29 = vld [vmem:[%s1244_s26 + $0x40] ss:$8 sps:$4 sm:$0xff]  }
  0x16   : > { %653 = vmatpush1.bf16.msra.mxu0 %v1108_v3  ;;  %1073 = vmatpush1.bf16.msra.mxu1 %v1108_v3  ;;  %v1145_v30 = vld [vmem:[%s1244_s26 + $0xc0] ss:$8 sps:$4 sm:$0xff]   ;;  %v1146_v31 = vld [vmem:[%s1244_s26 + $0x54] ss:$8 sps:$4 sm:$0xff]   ;;  %v1150_v33 = vld [vmem:[%s1244_s26 + $0x50] ss:$8 sps:$4 sm:$0xff]  }
  0x17   : > { %654 = vmatprep.subr.bf16.mxu0 %v1188_v1  ;;  %1064 = vmatprep.subr.bf16.mxu1 %v1188_v1  ;;  %v1148_v32 = vld [vmem:[%s1244_s26 + $0xd4] ss:$8 sps:$4 sm:$0xff]   ;;  %v1151_v34 = vld [vmem:[%s1244_s26 + $0xd0] ss:$8 sps:$4 sm:$0xff]   ;;  %v1152_v35 = vld [vmem:[%s1244_s26 + $0x64] ss:$8 sps:$4 sm:$0xff]  }
  0x18   : > { %v1154_v36 = vld [vmem:[%s1244_s26 + $0xe4] ss:$8 sps:$4 sm:$0xff]   ;;  %v1156_v37 = vld [vmem:[%s1244_s26 + $0x60] ss:$8 sps:$4 sm:$0xff]   ;;  %v1158_v39 = vld [vmem:[%s1244_s26 + $0x74] ss:$8 sps:$4 sm:$0xff]  }
  0x19   : > { %v1157_v38 = vld [vmem:[%s1244_s26 + $0xe0] ss:$8 sps:$4 sm:$0xff]   ;;  %v1160_v40 = vld [vmem:[%s1244_s26 + $0xf4] ss:$8 sps:$4 sm:$0xff]   ;;  %v1162_v41 = vld [vmem:[%s1244_s26 + $0x70] ss:$8 sps:$4 sm:$0xff]  }
  0x1a   : > { %655 = vmatpush1.bf16.msra.mxu0 %v1109_v4  ;;  %1074 = vmatpush1.bf16.msra.mxu1 %v1109_v4  ;;  %v1163_v42 = vld [vmem:[%s1244_s26 + $0xf0] ss:$8 sps:$4 sm:$0xff]   ;;  %v1318_v43 = vld [vmem:[%s1402_s2] ss:$0 sm:$0xff] }
  0x1b   : > { %656 = vmatprep.subr.bf16.mxu0 %v1188_v1  ;;  %1065 = vmatprep.subr.bf16.mxu1 %v1188_v1 }
  0x1e   : > { %657 = vmatpush1.bf16.msra.mxu0 %v1110_v7  ;;  %1075 = vmatpush1.bf16.msra.mxu1 %v1110_v7 }
  0x1f   : > { %658 = vmatprep.subr.bf16.mxu0 %v1188_v1  ;;  %1066 = vmatprep.subr.bf16.mxu1 %v1188_v1 }
  0x22   : > { %659 = vmatpush1.bf16.msra.mxu0 %v1111_v8  ;;  %1076 = vmatpush1.bf16.msra.mxu1 %v1111_v8 }
  0x23   : > { %660 = vmatprep.subr.bf16.mxu0 %v1188_v1  ;;  %1067 = vmatprep.subr.bf16.mxu1 %v1188_v1 }
  0x26   : > { %661 = vmatpush1.bf16.msra.mxu0 %v1112_v9  ;;  %1077 = vmatpush1.bf16.msra.mxu1 %v1112_v9 }
  0x27   : > { %662 = vmatprep.subr.bf16.mxu0 %v1188_v1  ;;  %1068 = vmatprep.subr.bf16.mxu1 %v1188_v1 }
  0x2a   : > { %663 = vmatpush1.bf16.msra.mxu0 %v1113_v10  ;;  %1078 = vmatpush1.bf16.msra.mxu1 %v1113_v10 }
  0x2b   : > { %676 = vmatprep.subr.bf16.mxu0 %v1188_v1  ;;  %1069 = vmatprep.subr.bf16.mxu1 %v1188_v1 }
  0x2e   : > { %677 = vmatpush2.bf16.msra.mxu0 %v1114_v11  ;;  %1079 = vmatpush2.bf16.msra.mxu1 %v1114_v11 }
  0x2f   : > { %678 = vmatprep.subr.bf16.mxu0 %v1188_v1  ;;  %1070 = vmatprep.subr.bf16.mxu1 %v1188_v1 }
  0x32   : > { %679 = vmatpush2.bf16.msra.mxu0 %v1115_v12  ;;  %1080 = vmatpush2.bf16.msra.mxu1 %v1115_v12 }
  0x35   : > { %681 = vmatmul.mubr.bf16.vlgmr.msra.gmra.mxu0 %v1116_v13  ;;  %745 = vmatmul.mubr.bf16.vlgmr.msra.gmra.mxu1 %v1119_v14 }
  0x36   : > { %1043 = vmatprep.mubr.msk.bf16.mxu0 %vm599_vm0, %v1122_v15  ;;  %1051 = vmatprep.mubr.msk.bf16.mxu1 %vm599_vm0, %v1124_v16 }
  0x3d   : > { %689 = vmatmul.mubr.bf16.gmra.mxu0 %v1126_v17  ;;  %753 = vmatmul.mubr.bf16.gmra.mxu1 %v1127_v18 }
  0x3e   : > { %1044 = vmatprep.mubr.msk.bf16.mxu0 %vm599_vm0, %v1128_v19  ;;  %1052 = vmatprep.mubr.msk.bf16.mxu1 %vm599_vm0, %v1130_v20 }
  0x45   : > { %697 = vmatmul.mubr.bf16.gmra.mxu0 %v1132_v21  ;;  %761 = vmatmul.mubr.bf16.gmra.mxu1 %v1133_v22 }
  0x46   : > { %1045 = vmatprep.mubr.msk.bf16.mxu0 %vm599_vm0, %v1134_v23  ;;  %1053 = vmatprep.mubr.msk.bf16.mxu1 %vm599_vm0, %v1136_v24 }
  0x4d   : > { %705 = vmatmul.mubr.bf16.gmra.mxu0 %v1138_v25  ;;  %769 = vmatmul.mubr.bf16.gmra.mxu1 %v1139_v26 }
  0x4e   : > { %1046 = vmatprep.mubr.msk.bf16.mxu0 %vm599_vm0, %v1140_v27  ;;  %1054 = vmatprep.mubr.msk.bf16.mxu1 %vm599_vm0, %v1142_v28 }
  0x55   : > { %713 = vmatmul.mubr.bf16.gmra.mxu0 %v1144_v29  ;;  %777 = vmatmul.mubr.bf16.gmra.mxu1 %v1145_v30 }
  0x56   : > { %1047 = vmatprep.mubr.msk.bf16.mxu0 %vm599_vm0, %v1146_v31  ;;  %1055 = vmatprep.mubr.msk.bf16.mxu1 %vm599_vm0, %v1148_v32 }
  0x5d   : > { %721 = vmatmul.mubr.bf16.gmra.mxu0 %v1150_v33  ;;  %785 = vmatmul.mubr.bf16.gmra.mxu1 %v1151_v34 }
  0x5e   : > { %1048 = vmatprep.mubr.msk.bf16.mxu0 %vm599_vm0, %v1152_v35  ;;  %1056 = vmatprep.mubr.msk.bf16.mxu1 %vm599_vm0, %v1154_v36 }
  0x65   : > { %729 = vmatmul.mubr.bf16.gmra.mxu0 %v1156_v37  ;;  %793 = vmatmul.mubr.bf16.gmra.mxu1 %v1157_v38 }
  0x66   : > { %1049 = vmatprep.mubr.msk.bf16.mxu0 %vm599_vm0, %v1158_v39  ;;  %1057 = vmatprep.mubr.msk.bf16.mxu1 %vm599_vm0, %v1160_v40 }
  0x6d   : > { %737 = vmatmul.mubr.bf16.gmra.mxu0 %v1162_v41  ;;  %801 = vmatmul.mubr.bf16.gmra.mxu1 %v1163_v42 }
  0xf5   : > { %v682_v44 = vpop.f32.mrf.mxu0  ;;  %v746_v45 = vpop.f32.mrf.mxu1 }
  0xf6   : > { %v809_v46 = vadd.f32 %v1318_v43, %v682_v44  ;;  %v825_v47 = vadd.f32 %v1318_v43, %v746_v45 }
  0xf7   : > { %v684_v48 = vpop.f32.mrf.mxu0  ;;  %v748_v49 = vpop.f32.mrf.mxu1 }
  0xf8   : > { %841 = vst [vmem:[%s1325_s22] sm:$0xff] %v809_v46  ;;  %857 = vst [vmem:[%s1325_s22 + $0x80] sm:$0xff] %v825_v47 }
  0xf9   : > { %v685_v50 = vpop.f32.mrf.mxu0  ;;  %v749_v51 = vpop.f32.mrf.mxu1 }
  0xfa   : > { %v810_v52 = vadd.f32 %v1318_v43, %v685_v50  ;;  %v826_v53 = vadd.f32 %v1318_v43, %v749_v51 }
  0xfb   : > { %v687_v54 = vpop.f32.mrf.mxu0  ;;  %v751_v55 = vpop.f32.mrf.mxu1 }
  0xfc   : > { %842 = vst [vmem:[%s1325_s22 + $0x8] sm:$0xff] %v810_v52  ;;  %858 = vst [vmem:[%s1325_s22 + $0x88] sm:$0xff] %v826_v53 }
  0xfd   : > { %v690_v56 = vpop.f32.mrf.mxu0  ;;  %v754_v57 = vpop.f32.mrf.mxu1 }
  0xfe   : > { %v811_v58 = vadd.f32 %v1318_v43, %v690_v56  ;;  %v827_v59 = vadd.f32 %v1318_v43, %v754_v57 }
  0xff   : > { %v692_v60 = vpop.f32.mrf.mxu0  ;;  %v756_v61 = vpop.f32.mrf.mxu1 }
 0x100   : > { %843 = vst [vmem:[%s1325_s22 + $0x10] sm:$0xff] %v811_v58  ;;  %859 = vst [vmem:[%s1325_s22 + $0x90] sm:$0xff] %v827_v59 }
 0x101   : > { %v693_v62 = vpop.f32.mrf.mxu0  ;;  %v757_v63 = vpop.f32.mrf.mxu1 }
 0x102   : > { %v812_v0 = vadd.f32 %v1318_v43, %v693_v62  ;;  %v828_v1 = vadd.f32 %v1318_v43, %v757_v63 }
 0x103   : > { %v695_v2 = vpop.f32.mrf.mxu0  ;;  %v759_v3 = vpop.f32.mrf.mxu1 }
 0x104   : > { %844 = vst [vmem:[%s1325_s22 + $0x18] sm:$0xff] %v812_v0  ;;  %860 = vst [vmem:[%s1325_s22 + $0x98] sm:$0xff] %v828_v1 }
 0x105   : > { %v698_v4 = vpop.f32.mrf.mxu0  ;;  %v762_v5 = vpop.f32.mrf.mxu1 }
 0x106   : > { %v813_v6 = vadd.f32 %v1318_v43, %v698_v4  ;;  %v829_v7 = vadd.f32 %v1318_v43, %v762_v5 }
 0x107   : > { %v700_v8 = vpop.f32.mrf.mxu0  ;;  %v764_v9 = vpop.f32.mrf.mxu1 }
 0x108   : > { %845 = vst [vmem:[%s1325_s22 + $0x20] sm:$0xff] %v813_v6  ;;  %861 = vst [vmem:[%s1325_s22 + $0xa0] sm:$0xff] %v829_v7 }
 0x109   : > { %v701_v10 = vpop.f32.mrf.mxu0  ;;  %v765_v11 = vpop.f32.mrf.mxu1 }
 0x10a   : > { %v814_v12 = vadd.f32 %v1318_v43, %v701_v10  ;;  %v830_v13 = vadd.f32 %v1318_v43, %v765_v11 }
 0x10b   : > { %v703_v14 = vpop.f32.mrf.mxu0  ;;  %v767_v15 = vpop.f32.mrf.mxu1 }
 0x10c   : > { %846 = vst [vmem:[%s1325_s22 + $0x28] sm:$0xff] %v814_v12  ;;  %862 = vst [vmem:[%s1325_s22 + $0xa8] sm:$0xff] %v830_v13 }
 0x10d   : > { %v706_v16 = vpop.f32.mrf.mxu0  ;;  %v770_v17 = vpop.f32.mrf.mxu1 }
 0x10e   : > { %v815_v18 = vadd.f32 %v1318_v43, %v706_v16  ;;  %v831_v19 = vadd.f32 %v1318_v43, %v770_v17 }
 0x10f   : > { %v708_v20 = vpop.f32.mrf.mxu0  ;;  %v772_v21 = vpop.f32.mrf.mxu1 }
 0x110   : > { %847 = vst [vmem:[%s1325_s22 + $0x30] sm:$0xff] %v815_v18  ;;  %863 = vst [vmem:[%s1325_s22 + $0xb0] sm:$0xff] %v831_v19 }
 0x111   : > { %v709_v22 = vpop.f32.mrf.mxu0  ;;  %v773_v23 = vpop.f32.mrf.mxu1 }
 0x112   : > { %v816_v24 = vadd.f32 %v1318_v43, %v709_v22  ;;  %v832_v25 = vadd.f32 %v1318_v43, %v773_v23 }
 0x113   : > { %v711_v26 = vpop.f32.mrf.mxu0  ;;  %v775_v27 = vpop.f32.mrf.mxu1 }
 0x114   : > { %848 = vst [vmem:[%s1325_s22 + $0x38] sm:$0xff] %v816_v24  ;;  %864 = vst [vmem:[%s1325_s22 + $0xb8] sm:$0xff] %v832_v25 }
 0x115   : > { %v714_v28 = vpop.f32.mrf.mxu0  ;;  %v778_v29 = vpop.f32.mrf.mxu1 }
 0x116   : > { %v817_v30 = vadd.f32 %v1318_v43, %v714_v28  ;;  %v833_v31 = vadd.f32 %v1318_v43, %v778_v29 }
 0x117   : > { %v716_v32 = vpop.f32.mrf.mxu0  ;;  %v780_v33 = vpop.f32.mrf.mxu1 }
 0x118   : > { %849 = vst [vmem:[%s1325_s22 + $0x40] sm:$0xff] %v817_v30  ;;  %865 = vst [vmem:[%s1325_s22 + $0xc0] sm:$0xff] %v833_v31 }
 0x119   : > { %v717_v34 = vpop.f32.mrf.mxu0  ;;  %v781_v35 = vpop.f32.mrf.mxu1 }
 0x11a   : > { %v818_v36 = vadd.f32 %v1318_v43, %v717_v34  ;;  %v834_v37 = vadd.f32 %v1318_v43, %v781_v35 }
 0x11b   : > { %v719_v38 = vpop.f32.mrf.mxu0  ;;  %v783_v39 = vpop.f32.mrf.mxu1 }
 0x11c   : > { %850 = vst [vmem:[%s1325_s22 + $0x48] sm:$0xff] %v818_v36  ;;  %866 = vst [vmem:[%s1325_s22 + $0xc8] sm:$0xff] %v834_v37 }
 0x11d   : > { %v722_v40 = vpop.f32.mrf.mxu0  ;;  %v786_v41 = vpop.f32.mrf.mxu1 }
 0x11e   : > { %v819_v42 = vadd.f32 %v1318_v43, %v722_v40  ;;  %v835_v44 = vadd.f32 %v1318_v43, %v786_v41 }
 0x11f   : > { %v724_v45 = vpop.f32.mrf.mxu0  ;;  %v788_v46 = vpop.f32.mrf.mxu1 }
 0x120   : > { %851 = vst [vmem:[%s1325_s22 + $0x50] sm:$0xff] %v819_v42  ;;  %867 = vst [vmem:[%s1325_s22 + $0xd0] sm:$0xff] %v835_v44 }
 0x121   : > { %v725_v47 = vpop.f32.mrf.mxu0  ;;  %v789_v48 = vpop.f32.mrf.mxu1 }
 0x122   : > { %v820_v49 = vadd.f32 %v1318_v43, %v725_v47  ;;  %v836_v50 = vadd.f32 %v1318_v43, %v789_v48 }
 0x123   : > { %v727_v51 = vpop.f32.mrf.mxu0  ;;  %v791_v52 = vpop.f32.mrf.mxu1 }
 0x124   : > { %852 = vst [vmem:[%s1325_s22 + $0x58] sm:$0xff] %v820_v49  ;;  %868 = vst [vmem:[%s1325_s22 + $0xd8] sm:$0xff] %v836_v50 }
 0x125   : > { %v730_v53 = vpop.f32.mrf.mxu0  ;;  %v794_v54 = vpop.f32.mrf.mxu1 }
 0x126   : > { %v821_v55 = vadd.f32 %v1318_v43, %v730_v53  ;;  %v837_v56 = vadd.f32 %v1318_v43, %v794_v54 }
 0x127   : > { %v732_v57 = vpop.f32.mrf.mxu0  ;;  %v796_v58 = vpop.f32.mrf.mxu1 }
 0x128   : > { %853 = vst [vmem:[%s1325_s22 + $0x60] sm:$0xff] %v821_v55  ;;  %869 = vst [vmem:[%s1325_s22 + $0xe0] sm:$0xff] %v837_v56 }
 0x129   : > { %v733_v59 = vpop.f32.mrf.mxu0  ;;  %v797_v60 = vpop.f32.mrf.mxu1 }
 0x12a   : > { %v822_v61 = vadd.f32 %v1318_v43, %v733_v59  ;;  %v838_v62 = vadd.f32 %v1318_v43, %v797_v60 }
 0x12b   : > { %v735_v63 = vpop.f32.mrf.mxu0  ;;  %v799_v0 = vpop.f32.mrf.mxu1 }
 0x12c   : > { %854 = vst [vmem:[%s1325_s22 + $0x68] sm:$0xff] %v822_v61  ;;  %870 = vst [vmem:[%s1325_s22 + $0xe8] sm:$0xff] %v838_v62 }
 0x12d   : > { %v738_v1 = vpop.f32.mrf.mxu0  ;;  %v802_v2 = vpop.f32.mrf.mxu1 }
 0x12e   : > { %v823_v3 = vadd.f32 %v1318_v43, %v738_v1  ;;  %v839_v4 = vadd.f32 %v1318_v43, %v802_v2 }
 0x12f   : > { %v740_v5 = vpop.f32.mrf.mxu0  ;;  %v804_v6 = vpop.f32.mrf.mxu1 }
 0x130   : > { %855 = vst [vmem:[%s1325_s22 + $0x70] sm:$0xff] %v823_v3  ;;  %871 = vst [vmem:[%s1325_s22 + $0xf0] sm:$0xff] %v839_v4 }
 0x131   : > { %v741_v7 = vpop.f32.mrf.mxu0  ;;  %v805_v8 = vpop.f32.mrf.mxu1 }
 0x132   : > { %v824_v9 = vadd.f32 %v1318_v43, %v741_v7  ;;  %v840_v10 = vadd.f32 %v1318_v43, %v805_v8 }
 0x133   : > { %v743_v11 = vpop.f32.mrf.mxu0  ;;  %v807_v12 = vpop.f32.mrf.mxu1 }
 0x134   : > { %856 = vst [vmem:[%s1325_s22 + $0x78] sm:$0xff] %v824_v9  ;;  %872 = vst [vmem:[%s1325_s22 + $0xf8] sm:$0xff] %v840_v10 }
 0x135 PF: > { %s13_s14 = sadd.s32 1, %s1186_s14   ;;  %s1404_s12 = smov %s1182_s13 }
 0x136   : > { %p10_p5 = scmp.ge.s32.totalorder %s13_s14, 4   ;;  %s1405_s13 = smov %s1407_s15 }
 0x138   :  { %12 = sbr.rel (!%p10_p5) target bundleno = 2 (0x2), region = 72 }

</bundles_post_ra>
